<compile_context>
chip_gen: v7x
topology: tpu7x:2x2x1
jax: 0.10.0
libtpu: 0.0.40
codegen_flags: <defaults>
</compile_context>

<pallas_src>
import math
from functools import partial

import jax
import jax.numpy as jnp
from jax import lax
from jax.experimental import pallas as pl
from jax.experimental.pallas import tpu as pltpu

_VMEM_BUDGET_BYTES = 48 * 1024 * 1024   # fits v5e/v6e (128 MiB) and v7x (64 MiB/TC)
_LANE = 128


def _pick_tile(dim: int, cap: int, align: int = _LANE) -> int:
    """Full dim if it fits under `cap`, else the largest multiple of `align` <= cap."""
    if dim <= cap:
        return dim
    return max(align, (min(dim, cap) // align) * align)


# ----------------------------- kernels --------------------------------------


def _dot_kernel(scale, src_ref, tgt_ref, out_ref):
    # Pure element-wise work on lane-dense (rows, cols) tiles.
    score = src_ref[...] * tgt_ref[...]
    if scale is not None:
        score = score * scale
    out_ref[...] = score.astype(out_ref.dtype)


def _general_kernel(use_bf16, src_ref, tgt_ref, w_ref, b_ref, out_ref):
    src = src_ref[...]          # (TR, H)  -- up to 1024 rows fed to the MXU at once
    w = w_ref[...]              # (TN, H)  -- W_a consumed untransposed (output-dim tile)
    if use_bf16:
        src = src.astype(jnp.bfloat16)
        w = w.astype(jnp.bfloat16)
    # torch Linear: y = x @ W^T + b  -> contract dim 1 of src with dim 1 of W.
    acc = lax.dot_general(
        src, w,
        dimension_numbers=(((1,), (1,)), ((), ())),
        preferred_element_type=jnp.float32,
    )                                                   # (TR, TN) f32
    # Fused bias add + broadcast-target multiply + cast, single store.
    out_ref[...] = ((acc + b_ref[...]) * tgt_ref[...]).astype(out_ref.dtype)


# ----------------------------- wrapper ---------------------------------------


def attention_forward(source, target, w_a=None, b_a=None, *,
                      alignment="general", use_bf16_matmul=False):
    """source: (B, S, H), target: (B, H). Returns attention_score (B, S, H)."""
    B, S, H = source.shape
    assert target.shape == (B, H)
    dtype = source.dtype
    itemsize = jnp.dtype(dtype).itemsize

    if alignment in ("dot", "scaled_dot"):
        SH = S * H
        # Lane-dense view: fold (S, H) into one lane axis (multiple of 128 when
        # SH >= 128) so stores are unmasked full-width vst.
        src2 = source.reshape(B, SH)
        # Pre-broadcast the target over S in the wrapper (reviewer-endorsed) so
        # the kernel is pure element-wise work with matching block shapes.
        tgt2 = jnp.broadcast_to(target[:, None, :], (B, S, H)).reshape(B, SH)

        tc = _pick_tile(SH, 4096)                       # lane tile (multiple of 128)
        # rows/block sized so ~3 arrays x 2 pipeline buffers fit the VMEM budget
        row_cap = max(8, _VMEM_BUDGET_BYTES // (8 * tc * itemsize))
        tb = _pick_tile(B, min(512, row_cap), align=8)

        grid = (pl.cdiv(B, tb), pl.cdiv(SH, tc))
        spec = pl.BlockSpec((tb, tc), lambda i, j: (i, j))
        scale = 1.0 / math.sqrt(float(H)) if alignment == "scaled_dot" else None
        cost = pl.CostEstimate(
            flops=2 * B * SH,
            transcendentals=0,
            bytes_accessed=3 * B * SH * itemsize,
        )
        out = pl.pallas_call(
            partial(_dot_kernel, scale),
            out_shape=jax.ShapeDtypeStruct((B, SH), dtype),
            grid=grid,
            in_specs=[spec, spec],
            out_specs=spec,
            compiler_params=pltpu.CompilerParams(
                dimension_semantics=("parallel", "parallel"),
                vmem_limit_bytes=_VMEM_BUDGET_BYTES),
            cost_estimate=cost,
        )(src2, tgt2)
        return out.reshape(B, S, H)

    if alignment == "general":
        assert w_a is not None and b_a is not None
        R = B * S
        # Flatten rows so the MXU sees TR (>=128 when available) rows per matmul,
        # independent of the (possibly tiny) sequence length S.
        src2 = source.reshape(R, H)
        tgt2 = jnp.broadcast_to(target[:, None, :], (B, S, H)).reshape(R, H)
        b2 = b_a.reshape(1, H)

        tn = _pick_tile(H, 512)                         # W output-dim tile
        # budget: ~2 buffers x (src(tr,H) + tgt(tr,tn) + out(tr,tn)) per grid step
        per_row_bytes = (H + 2 * tn) * 4
        row_cap = max(128, _VMEM_BUDGET_BYTES // (4 * per_row_bytes))
        tr = _pick_tile(R, min(1024, row_cap))

        grid = (pl.cdiv(R, tr), pl.cdiv(H, tn))
        in_specs = [
            pl.BlockSpec((tr, H), lambda i, j: (i, 0)),    # source rows, full K
            pl.BlockSpec((tr, tn), lambda i, j: (i, j)),   # broadcast target slice
            pl.BlockSpec((tn, H), lambda i, j: (j, 0)),    # W_a output-dim tile (no transpose)
            pl.BlockSpec((1, tn), lambda i, j: (0, j)),    # bias slice
        ]
        out_spec = pl.BlockSpec((tr, tn), lambda i, j: (i, j))
        cost = pl.CostEstimate(
            flops=2 * R * H * H + 2 * R * H,
            transcendentals=0,
            bytes_accessed=(3 * R * H + H * H + H) * itemsize,
        )
        out = pl.pallas_call(
            partial(_general_kernel, use_bf16_matmul),
            out_shape=jax.ShapeDtypeStruct((R, H), dtype),
            grid=grid,
            in_specs=in_specs,
            out_specs=out_spec,
            compiler_params=pltpu.CompilerParams(
                dimension_semantics=("parallel", "parallel"),
                vmem_limit_bytes=_VMEM_BUDGET_BYTES),
            cost_estimate=cost,
        )(src2, tgt2, w_a, b2)
        return out.reshape(B, S, H)

    raise ValueError("alignment must be one of 'dot', 'scaled_dot', 'general'")


# ----------------------------- test -----------------------------------------

if __name__ == "__main__":
    B, S, H = 2, 8, 32                  # batch, input_sequence_length, hidden_dim

    key = jax.random.PRNGKey(0)
    k1, k2, k3, k4 = jax.random.split(key, 4)
    source = jax.random.normal(k1, (B, S, H), dtype=jnp.float32)   # source_hidden_states
    target = jax.random.normal(k2, (B, H), dtype=jnp.float32)      # target_hidden_state

    # Deterministic parameters for W_a = Linear(hidden_dim, hidden_dim)
    w_a = jax.random.normal(k3, (H, H), dtype=jnp.float32) * (1.0 / math.sqrt(H))
    b_a = jax.random.normal(k4, (H,), dtype=jnp.float32) * 0.01

    out_general = attention_forward(source, target, w_a, b_a, alignment="general")
    out_general_bf16 = attention_forward(source, target, w_a, b_a,
                                         alignment="general", use_bf16_matmul=True)
    out_scaled = attention_forward(source, target, alignment="scaled_dot")
    out_dot = attention_forward(source, target, alignment="dot")
    jax.block_until_ready((out_general, out_general_bf16, out_scaled, out_dot))

    # Plain-JAX reference (mirrors the torch forward semantics).
    tgt3 = target[:, None, :]
    ref_general = (jnp.einsum("bsh,kh->bsk", source, w_a) + b_a) * tgt3
    ref_scaled = source * tgt3 * (1.0 / math.sqrt(float(H)))
    ref_dot = source * tgt3

    assert jnp.allclose(out_general, ref_general, atol=1e-4, rtol=1e-4)
    assert jnp.allclose(out_general_bf16, ref_general, atol=1e-1, rtol=1e-1)
    assert jnp.allclose(out_scaled, ref_scaled, atol=1e-5, rtol=1e-5)
    assert jnp.allclose(out_dot, ref_dot, atol=1e-5, rtol=1e-5)
    print("KERNEL_OK")
</pallas_src>

<mosaic_0001>
module attributes {stable_mosaic.version = 11 : i64} {
  func.func @_general_kernel(%arg0: i32, %arg1: i32, %arg2: memref<16x32xf32, #tpu.memory_space<vmem>>, %arg3: memref<16x32xf32, #tpu.memory_space<vmem>>, %arg4: memref<32x32xf32, #tpu.memory_space<vmem>>, %arg5: memref<1x32xf32, #tpu.memory_space<vmem>>, %arg6: memref<16x32xf32, #tpu.memory_space<vmem>>) attributes {dimension_semantics = [#tpu.dimension_semantics<parallel>, #tpu.dimension_semantics<parallel>], iteration_bounds = array<i64: 1, 1>, scalar_prefetch = 0 : i64, scratch_operands = 0 : i64, tpu.core_type = #tpu.core_type<tc>, window_params = [{transform_indices = @transform_0, window_bounds = array<i64: 16, 32>}, {transform_indices = @transform_1, window_bounds = array<i64: 16, 32>}, {transform_indices = @transform_2, window_bounds = array<i64: 32, 32>}, {transform_indices = @transform_3, window_bounds = array<i64: 1, 32>}, {transform_indices = @transform_4, window_bounds = array<i64: 16, 32>}]} {
    %c0 = arith.constant 0 : index
    %c0_0 = arith.constant 0 : index
    %0 = vector.load %arg2[%c0, %c0_0] : memref<16x32xf32, #tpu.memory_space<vmem>>, vector<16x32xf32>
    %c0_1 = arith.constant 0 : index
    %c0_2 = arith.constant 0 : index
    %1 = vector.load %arg4[%c0_1, %c0_2] : memref<32x32xf32, #tpu.memory_space<vmem>>, vector<32x32xf32>
    %cst = arith.constant dense<0.000000e+00> : vector<16x32xf32>
    %2 = tpu.matmul %0, %1, %cst {dimension_numbers = #tpu.dot_dimension_numbers<[1], [1], [0], [0], [0, 0, 1, 0], [], []>} : vector<16x32xf32>, vector<32x32xf32>, vector<16x32xf32> -> vector<16x32xf32>
    %c0_3 = arith.constant 0 : index
    %c0_4 = arith.constant 0 : index
    %3 = vector.load %arg5[%c0_3, %c0_4] : memref<1x32xf32, #tpu.memory_space<vmem>>, vector<1x32xf32>
    %4 = vector.broadcast %3 : vector<1x32xf32> to vector<16x32xf32>
    %5 = arith.addf %2, %4 : vector<16x32xf32>
    %c0_5 = arith.constant 0 : index
    %c0_6 = arith.constant 0 : index
    %6 = vector.load %arg3[%c0_5, %c0_6] : memref<16x32xf32, #tpu.memory_space<vmem>>, vector<16x32xf32>
    %7 = arith.mulf %5, %6 : vector<16x32xf32>
    %c0_7 = arith.constant 0 : index
    %c0_8 = arith.constant 0 : index
    %8 = vector.load %arg6[%c0_7, %c0_8] : memref<16x32xf32, #tpu.memory_space<vmem>>, vector<16x32xf32>
    tpu.vector_store %arg6[%c0_7, %c0_8], %7 {strides = array<i32>} : memref<16x32xf32, #tpu.memory_space<vmem>>, vector<16x32xf32>,
    return
  }
  func.func @transform_0(%arg0: i32, %arg1: i32) -> (i32, i32) {
    %c0_i32 = arith.constant 0 : i32
    %c0_i32_0 = arith.constant 0 : i32
    return %arg0, %c0_i32 : i32, i32
  }
  func.func @transform_1(%arg0: i32, %arg1: i32) -> (i32, i32) {
    %c0_i32 = arith.constant 0 : i32
    return %arg0, %arg1 : i32, i32
  }
  func.func @transform_2(%arg0: i32, %arg1: i32) -> (i32, i32) {
    %c0_i32 = arith.constant 0 : i32
    %c0_i32_0 = arith.constant 0 : i32
    return %arg1, %c0_i32 : i32, i32
  }
  func.func @transform_3(%arg0: i32, %arg1: i32) -> (i32, i32) {
    %c0_i32 = arith.constant 0 : i32
    %c0_i32_0 = arith.constant 0 : i32
    return %c0_i32, %arg1 : i32, i32
  }
  func.func @transform_4(%arg0: i32, %arg1: i32) -> (i32, i32) {
    %c0_i32 = arith.constant 0 : i32
    return %arg0, %arg1 : i32, i32
  }
}

</mosaic_0001>

<bundles_post_ra>
// kernel: tpu_custom_call.1
= control target key start
LH: loop header
LB: loop body
LE: loop exit
PB: predicated region body
PF: predicated region fallthrough
CT: control target
= control target key end

     0   :  { %9 = vsyncpa [#allocation3], 0  ;;  %s433_s0 = inlined_call_operand.hbm [shape: f32[16,32], index: 0, kind: input, shape index: {}]   ;;  %s434_s1 = inlined_call_operand.hbm [shape: f32[16,32], index: 1, kind: input, shape index: {}]   ;;  %s435_s2 = inlined_call_operand.hbm [shape: f32[32,32], index: 2, kind: input, shape index: {}]   ;;  %s436_s3 = inlined_call_operand.vmem [shape: f32[1,32], index: 3, kind: input, shape index: {}]   ;;  %s437_s4 = inlined_call_operand.hbm [shape: f32[16,32], index: 4, kind: output, shape index: {}]  }
   0x1   :  { %10 = vsyncpa [#allocation6], 0 }
   0x2   :  { %11 = vsyncpa [#allocation4], 0  ;;  %s326_s15 = smov [#allocation5]   ;;  %s327_s17 = smov [#allocation2]  }
   0x3   :  { %s29_s16 = sshll.u32 %s326_s15, 4  ;;  %s17_s18 = sshll.u32 %s327_s17, 4  ;;  %s30_s16 = int_to_ptr.vmem [resolvable:$true] %s29_s16  ;;  %s357_s18 = int_to_ptr.vmem [resolvable:$true] %s17_s18 }
   0x4   :  { %s232_s21 = scalar_lea.hbm %s434_s1, 256 }
   0x5   :  { %p233_p0 = scmp.ne.s32.totalorder %s434_s1, %s232_s21  ;;  %p236_p1 = scmp.lt.u32.totalorder %s232_s21, %s434_s1 }
   0x7   :  { %p238_p2 = pnand %p236_p1, %p233_p0 }
   0x9   :  { %241 = shalt.err (!%p238_p2)
}
   0xa   :  { %s242_s26 = scalar_lea.vmem %s30_s16, 256  ;;  %p247_p4 = scmp.lt.s32.totalorder %s30_s16, %s30_s16 }
   0xb   :  { %p243_p3 = scmp.ne.s32.totalorder %s30_s16, %s242_s26  ;;  %p248_p5 = scmp.lt.s32.totalorder %s242_s26, %s242_s26 }
   0xd   :  { %p249_p6 = por %p248_p5, %p247_p4 }
   0xf   :  { %p250_p7 = pnand %p249_p6, %p243_p3 }
  0x11   :  { %253 = shalt.err (!%p250_p7)
}
  0x12   :  { %s328_s27 = smov 128   ;;  %s329_s28 = smov 8  }
  0x13   :  { %35 = dma.hbm_to_vmem [thread:$0]  %s434_s1, 256, %s30_s16, [#allocation6], %s328_s27, %s328_s27, %s329_s28  }
  0x14   :  { %s254_s7 = scalar_lea.hbm %s433_s0, 256 }
  0x15   :  { %p255_p8 = scmp.ne.s32.totalorder %s433_s0, %s254_s7  ;;  %p258_p9 = scmp.lt.u32.totalorder %s254_s7, %s433_s0 }
  0x17   :  { %p260_p10 = pnand %p258_p9, %p255_p8 }
  0x19   :  { %263 = shalt.err (!%p260_p10)
}
  0x1a   :  { %s264_s12 = scalar_lea.vmem %s357_s18, 256  ;;  %p269_p12 = scmp.lt.s32.totalorder %s357_s18, %s357_s18 }
  0x1b   :  { %p265_p11 = scmp.ne.s32.totalorder %s357_s18, %s264_s12  ;;  %p270_p13 = scmp.lt.s32.totalorder %s264_s12, %s264_s12 }
  0x1d   :  { %p271_p0 = por %p270_p13, %p269_p12 }
  0x1f   :  { %p272_p1 = pnand %p271_p0, %p265_p11 }
  0x21   :  { %275 = shalt.err (!%p272_p1)
}
  0x22   :  { %23 = dma.hbm_to_vmem [thread:$0]  %s433_s0, 256, %s357_s18, [#allocation3], %s328_s27, %s328_s27, %s329_s28  }
  0x23   :  { %s330_s14 = smov [#allocation7]   ;;  %s276_s19 = scalar_lea.hbm %s435_s2, 512 }
  0x24   :  { %s41_s15 = sshll.u32 %s330_s14, 4  ;;  %p277_p2 = scmp.ne.s32.totalorder %s435_s2, %s276_s19  ;;  %s42_s15 = int_to_ptr.vmem [resolvable:$true] %s41_s15 }
  0x25   :  { %p280_p3 = scmp.lt.u32.totalorder %s276_s19, %s435_s2 }
  0x27   :  { %p282_p4 = pnand %p280_p3, %p277_p2 }
  0x29   :  { %285 = shalt.err (!%p282_p4)
}
  0x2a   :  { %s286_s24 = scalar_lea.vmem %s42_s15, 512  ;;  %p291_p6 = scmp.lt.s32.totalorder %s42_s15, %s42_s15 }
  0x2b   :  { %p287_p5 = scmp.ne.s32.totalorder %s42_s15, %s286_s24  ;;  %p292_p7 = scmp.lt.s32.totalorder %s286_s24, %s286_s24 }
  0x2d   :  { %p293_p8 = por %p292_p7, %p291_p6 }
  0x2f   :  { %p294_p9 = pnand %p293_p8, %p287_p5 }
  0x31   :  { %297 = shalt.err (!%p294_p9)
}
  0x32   :  { %47 = dma.hbm_to_vmem [thread:$0]  %s435_s2, 512, %s42_s15, [#allocation6], %s328_s27, %s328_s27, %s329_s28  }
  0x33   :  { %320 = dma.done.wait [#allocation3], 256  }
  0x34   :  { %321 = vsyncadd [#allocation3], 4294967040 }
  0x35   :  { %322 = dma.done.wait [#allocation6], 768  }
  0x36   :  { %323 = vsyncadd [#allocation6], 4294966528  ;;  %vm72_vm0 = vcmask 261120   ;;  %v61_v0 = vld [vmem:[#allocation7] sm:$0xff]  ;;  %v62_v1 = vld [vmem:[#allocation7 + $0x8] sm:$0xff]  ;;  %s331_s26 = smov [#allocation8]  }
  0x37   :  { %vm215_vm1 = vmpackc.low %vm72_vm0, %vm72_vm0  ;;  %v63_v2 = vld [vmem:[#allocation7 + $0x10] sm:$0xff]  ;;  %v214_v3 = vpack.c.bf16 %v62_v1, %v61_v0  ;;  %v64_v4 = vld [vmem:[#allocation7 + $0x18] sm:$0xff]  ;;  %s177_s29 = sshll.u32 %s331_s26, 4  ;;  %s178_s29 = int_to_ptr.vmem [resolvable:$true] %s177_s29 }
  0x38   :  { %v59_v5 = vld [vmem:[#allocation2] sm:$0xff]  ;;  %v220_v6 = vpack.c.bf16 %v64_v4, %v63_v2  ;;  %v60_v7 = vld [vmem:[#allocation2 + $0x8] sm:$0xff]  ;;  %v167_v10 = vld [vmem:[#allocation5 + $0x8] sm:$0xff]  ;;  %s298_s30 = scalar_lea.vmem %s178_s29, 256  ;;  %p303_p11 = scmp.lt.s32.totalorder %s178_s29, %s178_s29 }
  0x39   :  { %211 = vmatprep.mubr.msk.f32.mxu0 %vm72_vm0, %v59_v5  ;;  %216 = vmatprep.subr.msk.bf16.mxu0 %vm215_vm1, %v214_v3  ;;  %v190_v8 = vld [vmem:[%s436_s3] ss:$0 sm:$0xff]  ;;  %v166_v13 = vld [vmem:[#allocation5] sm:$0xff]  ;;  %p299_p10 = scmp.ne.s32.totalorder %s178_s29, %s298_s30  ;;  %p304_p12 = scmp.lt.s32.totalorder %s298_s30, %s298_s30 }
  0x3a   :  { %219 = vmatpush3.bf16.xpose.msk.msra.mxu0 %vm215_vm1, %v214_v3 }
  0x3b   :  { %222 = vmatprep.subr.msk.bf16.mxu0 %vm215_vm1, %v220_v6  ;;  %p305_p13 = por %p304_p12, %p303_p11 }
  0x3d   :  { %p306_p0 = pnand %p305_p13, %p299_p10 }
  0x42   :  { %225 = vmatpush3.bf16.xpose.msk.msra.mxu0 %vm215_vm1, %v220_v6 }
  0x49   :  { %212 = vmatmul.mubr.msk.f32.vlgmr.msra.gmra.mrb[0].mxu0 %vm72_vm0, %v60_v7 }
 0x11c   :  { %v213_v9 = vpop.f32.mrb[0].mxu0 }
 0x11d   :  { %v163_v11 = vadd.f32 %v213_v9, %v190_v8  ;;  %v157_v12 = vpop.f32.mrb[1].mxu0 }
 0x11e   :  { %v158_v14 = vadd.f32 %v190_v8, %v157_v12 }
 0x11f   :  { %v169_v15 = vmul.f32 %v167_v10, %v163_v11 }
 0x120   :  { %v168_v16 = vmul.f32 %v166_v13, %v158_v14 }
 0x121   :  { %171 = vst.msk [vmem:[#allocation8 + $0x8] sm:$0xff] %vm72_vm0, %v169_v15 }
 0x122   :  { %170 = vst.msk [vmem:[#allocation8] sm:$0xff] %vm72_vm0, %v168_v16 }
 0x123   :  { %309 = shalt.err (!%p306_p0)
}
 0x124   :  { %s310_s6 = scalar_lea.hbm %s437_s4, 256 }
 0x125   :  { %p311_p1 = scmp.ne.s32.totalorder %s437_s4, %s310_s6  ;;  %p314_p2 = scmp.lt.u32.totalorder %s310_s6, %s437_s4 }
 0x127   :  { %p316_p3 = pnand %p314_p2, %p311_p1 }
 0x129   :  { %319 = shalt.err (!%p316_p3)
}
 0x12a   :  { %183 = dma.vmem_to_hbm [thread:$0]  %s178_s29, 256, %s437_s4, [#allocation4], %s328_s27, %s328_s27, %s329_s28  }
 0x12b   :  { %324 = dma.done.wait [#allocation4], 256  }
 0x12c   :  { %325 = vsyncadd [#allocation4], 4294967040 }
 0x12d   :  { %187 = vsyncpa [#allocation3], 1 }
 0x12e   :  { %188 = vsyncpa [#allocation6], 1 }
 0x12f   :  { %189 = vsyncpa [#allocation4], 1 }

</bundles_post_ra>
